<compile_context>
chip_gen: v5e
topology: v5e:2x2
jax: 0.10.0
libtpu: 0.0.40
codegen_flags: <defaults>
</compile_context>

<pallas_src>
import functools
import math

import jax
import jax.numpy as jnp
from jax import lax
from jax.experimental import pallas as pl
from jax.experimental.pallas import tpu as pltpu


# ----------------------------------------------------------------------------- reco update
def _add_kernel(x_ref, reco_ref, out_ref):
    # updated_reco = x + reco (trivial VPU work, run exactly once, tiled).
    out_ref[...] = x_ref[...] + reco_ref[...]


def _updated_reco(x, reco):
    H, W = x.shape
    tile_h = H if (H <= 256 or H % 256 != 0) else 256      # lane-dense row blocks
    spec = pl.BlockSpec((tile_h, W), lambda i: (i, 0))
    return pl.pallas_call(
        _add_kernel,
        grid=(H // tile_h,),
        in_specs=[spec, spec],
        out_specs=spec,
        out_shape=jax.ShapeDtypeStruct((H, W), jnp.float32),
        compiler_params=pltpu.CompilerParams(dimension_semantics=("parallel",)),
    )(x.astype(jnp.float32), reco.astype(jnp.float32))


# ----------------------------------------------------------------------------- projector
def _fan_proj_kernel(geom_ref, volt_ref, sino_ref, *, H, W, L, S, dt, unroll):
    """One grid step = one dense block of L (angle, detector) rays.

    geom_ref : (1, 5, L)  lane-dense per-ray geometry rows [ux, uy, fx0, fy0, t0]
    volt_ref : (W, H)     transposed volume, bf16, resident (single-buffered)
    sino_ref : (1, 1, L)  line integrals for this ray block
    """
    g = geom_ref[0]                                     # (5, L)
    ux, uy = g[0:1], g[1:2]
    fx0, fy0 = g[2:3], g[3:4]
    t0 = g[4:5]

    # loop-invariant pixel-index iotas (hoisted out of the sample loop)
    ii = lax.broadcasted_iota(jnp.float32, (H, L), 0)   # y index
    jj = lax.broadcasted_iota(jnp.float32, (W, L), 0)   # x index

    vol_t = volt_ref[...]                               # (W, H) bf16, loaded once

    def body(s, acc):
        t = t0 + (s.astype(jnp.float32) + 0.5) * dt     # (1, L) distance along each ray
        fy = fy0 + t * uy                               # continuous pixel coordinates
        fx = fx0 + t * ux
        # exact bilinear "hat" weights relu(1 - |i - f|); implicitly zero outside the volume.
        wy = jnp.maximum(0.0, 1.0 - jnp.abs(ii - fy)).astype(jnp.bfloat16)   # (H, L) -> MXU
        wx = jnp.maximum(0.0, 1.0 - jnp.abs(jj - fx))                        # (W, L) f32, VPU
        # bilinear sample for all L rays at this depth:
        #   U[j, l] = sum_i vol[i, j] * wy[i, l]   (bf16 MXU, f32 accumulate)
        #   val[l]  = sum_j U[j, l] * wx[j, l]     (VPU multiply + sublane reduce)
        u_mat = jnp.dot(vol_t, wy, preferred_element_type=jnp.float32)       # (W, L)
        return acc + jnp.sum(u_mat * wx, axis=0, keepdims=True)

    acc = lax.fori_loop(0, S, body, jnp.zeros((1, L), jnp.float32), unroll=unroll)
    sino_ref[...] = (acc * dt).reshape(1, 1, L)         # line integral = sum * step length


def iterative_reco_forward(x, reco, angles, num_detectors, detector_spacing,
                           source_distance, isocenter_distance, num_steps=None,
                           lane_width=None, unroll=2):
    """Returns (current_sino, updated_reco), like IterativeRecoModel.forward."""
    H, W = x.shape
    A = int(angles.shape[0])
    D = int(num_detectors)
    S = int(num_steps) if num_steps is not None else 2 * max(H, W)
    sdd = float(source_distance)
    sid = float(isocenter_distance)
    spacing = float(detector_spacing)

    # per-ray integration window: +/- radius around the closest approach to the isocenter
    radius = 0.5 * math.hypot(H, W) + 1.0
    dt = 2.0 * radius / S

    # 1) updated_reco = x + reco  (tiled Pallas add, run once)
    updated_reco = _updated_reco(x, reco)

    # layout plumbing hoisted out of the kernel: transpose + bf16 cast done once, so the
    # per-sample matmul runs on the native bf16 MXU and vol_t's VMEM residency is halved.
    vol_t = jnp.transpose(updated_reco).astype(jnp.bfloat16)            # (W, H)

    # 2) flat (angle, detector) -> lane packing
    total = A * D
    if lane_width is None:
        # 256 fills the v6e/v7x MXU N dim; fall back to 128 for tiny problems so the grid keeps
        # >= 2 steps (megacore balance).  TODO(synk): prefer 128 on v5e (its MXU N is 128).
        lane_width = 256 if total >= 2 * 256 else 128
    L = int(lane_width)
    n_blk = max(1, (total + L - 1) // L)

    flat = jnp.arange(n_blk * L, dtype=jnp.int32)
    ang_idx = jnp.minimum(flat // D, A - 1)        # padded lanes get finite geometry, sliced off
    det_idx = (flat % D).astype(jnp.float32)
    theta = angles.astype(jnp.float32)[ang_idx]
    ca, sa = jnp.cos(theta), jnp.sin(theta)
    u = (det_idx - 0.5 * (D - 1)) * spacing         # lateral detector offset
    rx = sdd * ca - u * sa                          # ray direction = sdd * c + u * e
    ry = sdd * sa + u * ca
    inv_len = 1.0 / jnp.sqrt(rx * rx + ry * ry)     # = 1 / sqrt(sdd^2 + u^2)
    ux, uy = rx * inv_len, ry * inv_len             # unit ray direction
    fx0 = -sid * ca + 0.5 * (W - 1)                 # source position in pixel coordinates
    fy0 = -sid * sa + 0.5 * (H - 1)
    t0 = sid * sdd * inv_len - radius               # closest approach to isocenter minus radius
    geom = jnp.stack([ux, uy, fx0, fy0, t0], axis=0)                    # (5, n_blk*L)
    geom = geom.reshape(5, n_blk, L).transpose(1, 0, 2).astype(jnp.float32)   # (n_blk, 5, L)

    kernel = functools.partial(_fan_proj_kernel, H=H, W=W, L=L, S=S, dt=dt,
                               unroll=int(unroll))

    grid_spec = pltpu.PrefetchScalarGridSpec(
        num_scalar_prefetch=0,
        grid=(n_blk,),
        in_specs=[
            pl.BlockSpec((1, 5, L), lambda b: (b, 0, 0)),               # per-ray geometry
            pl.BlockSpec((W, H), lambda b: (0, 0),                      # resident volume:
                         pipeline_mode=pl.Buffered(1)),                 # constant index map ->
        ],                                                              # single-buffered
        out_specs=pl.BlockSpec((1, 1, L), lambda b: (b, 0, 0)),
    )

    sino_blocks = pl.pallas_call(
        kernel,
        out_shape=jax.ShapeDtypeStruct((n_blk, 1, L), jnp.float32),
        grid_spec=grid_spec,
        compiler_params=pltpu.CompilerParams(
            # independent ray blocks -> megacore sharding on v7x
            dimension_semantics=("parallel",),
            # bf16 volume + single-buffering keeps the working set small; 48 MiB leaves headroom
            # under v7x's 64 MiB physical VMEM even for ~2048^2 volumes.
            vmem_limit_bytes=48 * 1024 * 1024,
        ),
    )(geom, vol_t)

    current_sino = sino_blocks.reshape(n_blk * L)[:total].reshape(A, D)
    return current_sino, updated_reco


# ----------------------------------------------------------------------------- pure-jnp reference
def _reference_fan_projection(vol, angles, D, spacing, sdd, sid, S):
    """f32 reference of the same discretization (validates the bf16 MXU path)."""
    H, W = vol.shape
    radius = 0.5 * math.hypot(H, W) + 1.0
    dt = 2.0 * radius / S
    theta = angles.astype(jnp.float32)[:, None]                         # (A, 1)
    det = jnp.arange(D, dtype=jnp.float32)[None, :]                     # (1, D)
    u = (det - 0.5 * (D - 1)) * spacing
    ca, sa = jnp.cos(theta), jnp.sin(theta)
    rx, ry = sdd * ca - u * sa, sdd * sa + u * ca
    inv_len = 1.0 / jnp.sqrt(rx * rx + ry * ry)
    ux, uy = rx * inv_len, ry * inv_len
    fx0, fy0 = -sid * ca + 0.5 * (W - 1), -sid * sa + 0.5 * (H - 1)
    t0 = sid * sdd * inv_len - radius
    s = jnp.arange(S, dtype=jnp.float32)[:, None, None]
    t = t0[None] + (s + 0.5) * dt                                       # (S, A, D)
    fx, fy = fx0[None] + t * ux[None], fy0[None] + t * uy[None]
    x0, y0 = jnp.floor(fx), jnp.floor(fy)
    wx1, wy1 = fx - x0, fy - y0

    def tap(yy, xx):
        yi, xi = yy.astype(jnp.int32), xx.astype(jnp.int32)
        inb = (yi >= 0) & (yi < H) & (xi >= 0) & (xi < W)
        v = vol[jnp.clip(yi, 0, H - 1), jnp.clip(xi, 0, W - 1)]
        return jnp.where(inb, v, 0.0)

    val = (tap(y0, x0) * (1 - wy1) * (1 - wx1) + tap(y0, x0 + 1) * (1 - wy1) * wx1
           + tap(y0 + 1, x0) * wy1 * (1 - wx1) + tap(y0 + 1, x0 + 1) * wy1 * wx1)
    return val.sum(axis=0) * dt


if __name__ == "__main__":
    key = jax.random.PRNGKey(0)

    # small synthetic geometry consistent with the module's __init__
    H = W = 16
    volume_shape = (H, W)
    A = 8                                   # number of projection angles
    num_detectors = 24
    detector_spacing = 1.5
    source_distance = 60.0                  # source -> detector distance
    isocenter_distance = 30.0               # source -> isocenter distance

    angles = jnp.linspace(0.0, 2.0 * math.pi, A, endpoint=False).astype(jnp.float32)

    # nn.Parameter(torch.zeros(volume_shape)) -> deterministic zeros
    reco_param = jnp.zeros(volume_shape, jnp.float32)
    x = jax.random.uniform(key, volume_shape, dtype=jnp.float32)

    current_sino, updated_reco = iterative_reco_forward(
        x, reco_param, angles, num_detectors, detector_spacing,
        source_distance, isocenter_distance)
    jax.block_until_ready((current_sino, updated_reco))

    assert current_sino.shape == (A, num_detectors)
    assert updated_reco.shape == volume_shape
    assert bool(jnp.all(jnp.isfinite(current_sino)))
    assert bool(jnp.allclose(updated_reco, x + reco_param, atol=1e-6))

    # validate the bf16-MXU projector against the pure-jnp f32 reference of the same discretization
    ref = _reference_fan_projection(updated_reco, angles, num_detectors, detector_spacing,
                                    source_distance, isocenter_distance, 2 * max(H, W))
    err = float(jnp.max(jnp.abs(current_sino - ref)))
    tol = 2e-2 * float(jnp.max(jnp.abs(ref))) + 1e-3
    assert err <= tol, f"sinogram mismatch: max err {err} > tol {tol}"

    print("KERNEL_OK")
</pallas_src>

<mosaic_0001>
module attributes {stable_mosaic.version = 11 : i64} {
  func.func @_add_kernel(%arg0: i32, %arg1: memref<16x16xf32, #tpu.memory_space<vmem>>, %arg2: memref<16x16xf32, #tpu.memory_space<vmem>>, %arg3: memref<16x16xf32, #tpu.memory_space<vmem>>) attributes {dimension_semantics = [#tpu.dimension_semantics<parallel>], iteration_bounds = array<i64: 1>, scalar_prefetch = 0 : i64, scratch_operands = 0 : i64, tpu.core_type = #tpu.core_type<tc>, window_params = [{transform_indices = @transform_0, window_bounds = array<i64: 16, 16>}, {transform_indices = @transform_1, window_bounds = array<i64: 16, 16>}, {transform_indices = @transform_2, window_bounds = array<i64: 16, 16>}]} {
    %c0 = arith.constant 0 : index
    %c0_0 = arith.constant 0 : index
    %0 = vector.load %arg1[%c0, %c0_0] : memref<16x16xf32, #tpu.memory_space<vmem>>, vector<16x16xf32>
    %c0_1 = arith.constant 0 : index
    %c0_2 = arith.constant 0 : index
    %1 = vector.load %arg2[%c0_1, %c0_2] : memref<16x16xf32, #tpu.memory_space<vmem>>, vector<16x16xf32>
    %2 = arith.addf %0, %1 : vector<16x16xf32>
    %c0_3 = arith.constant 0 : index
    %c0_4 = arith.constant 0 : index
    %3 = vector.load %arg3[%c0_3, %c0_4] : memref<16x16xf32, #tpu.memory_space<vmem>>, vector<16x16xf32>
    tpu.vector_store %arg3[%c0_3, %c0_4], %2 {strides = array<i32>} : memref<16x16xf32, #tpu.memory_space<vmem>>, vector<16x16xf32>,
    return
  }
  func.func @transform_0(%arg0: i32) -> (i32, i32) {
    %c0_i32 = arith.constant 0 : i32
    %c0_i32_0 = arith.constant 0 : i32
    return %arg0, %c0_i32 : i32, i32
  }
  func.func @transform_1(%arg0: i32) -> (i32, i32) {
    %c0_i32 = arith.constant 0 : i32
    %c0_i32_0 = arith.constant 0 : i32
    return %arg0, %c0_i32 : i32, i32
  }
  func.func @transform_2(%arg0: i32) -> (i32, i32) {
    %c0_i32 = arith.constant 0 : i32
    %c0_i32_0 = arith.constant 0 : i32
    return %arg0, %c0_i32 : i32, i32
  }
}

</mosaic_0001>

<bundles_post_ra>
// kernel: tpu_custom_call.1
= control target key start
LH: loop header
LB: loop body
LE: loop exit
PB: predicated region body
PF: predicated region fallthrough
CT: control target
= control target key end

     0   :  { %7 = vsyncpa [#allocation3], 0  ;;  %s185_s0 = inlined_call_operand.hbm [shape: f32[16,16], index: 0, kind: input, shape index: {}]   ;;  %s186_s1 = inlined_call_operand.hbm [shape: f32[16,16], index: 1, kind: input, shape index: {}]   ;;  %s187_s2 = inlined_call_operand.hbm [shape: f32[16,16], index: 2, kind: output, shape index: {}]  }
   0x1   :  { %8 = vsyncpa [#allocation6], 0 }
   0x2   :  { %9 = vsyncpa [#allocation4], 0  ;;  %s14_s11 = sshll.u32 %s185_s0, 4  ;;  %s156_s12 = smov [#allocation2]   ;;  %s15_s11 = int_to_ptr.hbm [resolvable:$true] %s14_s11 }
   0x3   :  { %s16_s13 = sshll.u32 %s156_s12, 4  ;;  %s27_s16 = sshll.u32 %s186_s1, 4  ;;  %s17_s13 = int_to_ptr.vmem [resolvable:$true] %s16_s13  ;;  %s28_s16 = int_to_ptr.hbm [resolvable:$true] %s27_s16 }
   0x4   :  { %s157_s17 = smov 128   ;;  %s158_s18 = smov 8  }
   0x5   :  { %22 = dma.hbm_to_vmem [thread:$0]  %s15_s11, 256, %s17_s13, [#allocation3], %s157_s17, %s157_s17, %s158_s18  }
   0x6   :  { %s159_s19 = smov [#allocation5]  }
   0x7   :  { %s29_s20 = sshll.u32 %s159_s19, 4  ;;  %s30_s20 = int_to_ptr.vmem [resolvable:$true] %s29_s20 }
   0x8   :  { %35 = dma.hbm_to_vmem [thread:$0]  %s28_s16, 256, %s30_s20, [#allocation6], %s157_s17, %s157_s17, %s158_s18  }
   0x9   :  { %150 = dma.done.wait [#allocation3], 256  }
   0xa   :  { %151 = vsyncadd [#allocation3], 4294967040 }
   0xb   :  { %152 = dma.done.wait [#allocation6], 256  }
   0xc   :  { %153 = vsyncadd [#allocation6], 4294967040  ;;  %s160_s0 = smov [#allocation7]   ;;  %s59_s24 = sshll.u32 %s187_s2, 4  ;;  %v44_v0 = vld [vmem:[#allocation2] sm:$0xff]  ;;  %v46_v1 = vld [vmem:[#allocation5] sm:$0xff]  ;;  %s60_s24 = int_to_ptr.hbm [resolvable:$true] %s59_s24 }
   0xd   :  { %s57_s21 = sshll.u32 %s160_s0, 4  ;;  %vm50_vm0 = vcmask 130048   ;;  %v45_v2 = vld [vmem:[#allocation2 + $0x8] sm:$0xff]  ;;  %v48_v3 = vadd.f32 %v46_v1, %v44_v0  ;;  %v47_v4 = vld [vmem:[#allocation5 + $0x8] sm:$0xff]  ;;  %s58_s21 = int_to_ptr.vmem [resolvable:$true] %s57_s21 }
   0xe   :  { %v49_v5 = vadd.f32 %v47_v4, %v45_v2 }
   0xf   :  { %51 = vst.msk [vmem:[#allocation7] sm:$0xff] %vm50_vm0, %v48_v3 }
  0x10   :  { %52 = vst.msk [vmem:[#allocation7 + $0x8] sm:$0xff] %vm50_vm0, %v49_v5 }
  0x11   :  { %65 = dma.vmem_to_hbm [thread:$0]  %s58_s21, 256, %s60_s24, [#allocation4], %s157_s17, %s157_s17, %s158_s18  }
  0x12   :  { %154 = dma.done.wait [#allocation4], 256  }
  0x13   :  { %155 = vsyncadd [#allocation4], 4294967040 }
  0x14   :  { %70 = vsyncpa [#allocation3], 1 }
  0x15   :  { %71 = vsyncpa [#allocation6], 1 }
  0x16   :  { %72 = vsyncpa [#allocation4], 1 }

</bundles_post_ra>
